<compile_context>
chip_gen: v6e
topology: v6e:2x2x1
jax: 0.10.0
libtpu: 0.0.40
codegen_flags: <defaults>
</compile_context>

<pallas_src>
import functools

import jax
import jax.numpy as jnp
import numpy as np
from jax.experimental import pallas as pl
from jax.experimental.pallas import tpu as pltpu

_MiB = 1024 * 1024


def _round_up(v, m):
    return ((v + m - 1) // m) * m


def _gconv_fc_kernel(w_ref, x_ref, wfc_ref, b_ref, o_ref, s_ref, ss_ref,
                     zz_ref, *, precision, J):
    """Fused gmul + fc (+ BN partial sums) for one block of TB graphs.

    w_ref:   (TB, N, J*N)  adjacency operators, col k = j*N + m (compute dtype)
    x_ref:   (TB, N, Cin)  node features                        (compute dtype)
    wfc_ref: (Cin, J*Cp)   fc weight, [f, j*Cp + c] = fc_weight[c, j*Cin + f]
    b_ref:   (1, Cp)       fc bias, zero in padded channels (f32)
    o_ref:   (TB, N, Cp)   pre-BN output (out dtype, lane-dense)
    s_ref:   (1, 1, Cp)    partial sum over this block's rows of (y - bias)
    ss_ref:  (1, 1, Cp)    partial sum over this block's rows of (y - bias)^2
    zz_ref:  (TB, J*N, Cp) f32 VMEM scratch for the rearranged z
    """
    TB, N, Cin = x_ref.shape
    Cp = o_ref.shape[-1]

    # Stage 1: one MXU push computes every z_j for every graph in the block:
    #   z[(b,m), j*Cp + c] = sum_f x[b,m,f] * fc_weight[c, j*Cin + f]
    x2 = x_ref[...].reshape(TB * N, Cin)
    z = jnp.dot(x2, wfc_ref[...], precision=precision,
                preferred_element_type=jnp.float32)            # (TB*N, J*Cp)

    # Scatter the J (128-aligned) lane groups of z into j-major rows of the
    # scratch so stage 2 contracts over K = J*N in a single push per graph.
    # (Static sliced stores only: no lane-splitting reshape / concatenate.)
    for j in range(J):
        zz_ref[:, j * N:(j + 1) * N, :] = (
            z[:, j * Cp:(j + 1) * Cp].reshape(TB, N, Cp))

    zz = zz_ref[...].astype(w_ref.dtype)                        # (TB, J*N, Cp)

    # Stage 2: y[b,n,c] = sum_k W2[b,n,k] * zz[b,k,c]  with k = j*N + m.
    acc = jnp.einsum('bnk,bkc->bnc', w_ref[...], zz,
                     precision=precision,
                     preferred_element_type=jnp.float32)        # (TB, N, Cp) f32

    o_ref[...] = (acc + b_ref[...]).astype(o_ref.dtype)

    # BN partial statistics on the bias-centered value (acc == y - bias):
    # exactly zero for zero-padded graphs and less cancellation when variance
    # is recovered as E[a^2] - E[a]^2 outside.
    s_ref[...] = jnp.sum(acc, axis=(0, 1)).reshape(1, 1, Cp)
    ss_ref[...] = jnp.sum(acc * acc, axis=(0, 1)).reshape(1, 1, Cp)


def _tpu_vmem_and_cores():
    """(physical VMEM bytes per TensorCore, #TensorCores a 1-D grid can span)."""
    try:
        info = pltpu.get_tpu_info()
        vmem = int(getattr(info, "vmem_capacity_bytes", 0)) or 64 * _MiB
    except Exception:            # query unavailable: assume the smallest (v7x)
        vmem = 64 * _MiB
    # v7x: 64 MiB per TC and 2 TCs/chip.  v5e/v6e: 128 MiB, single TC.
    n_cores = 2 if vmem <= 64 * _MiB else 1
    return vmem, n_cores


def _pick_graphs_per_block(B, N, J, Cin, Cp, compute_dtype, out_dtype,
                           vmem_budget_bytes, max_rows=1024):
    """Largest TB whose tile-padded, double-buffered block footprint fits the
    VMEM budget; stops growing once the output slab reaches ~max_rows rows."""
    cs = np.dtype(compute_dtype).itemsize
    osz = np.dtype(out_dtype).itemsize
    sub_c = 8 * (4 // cs)            # sublane tile: f32 -> 8, bf16 -> 16
    sub_o = 8 * (4 // osz)
    NJ = N * J

    def footprint(tb):
        w_blk = tb * _round_up(N, sub_c) * _round_up(NJ, 128) * cs
        x_blk = tb * _round_up(N, sub_c) * _round_up(Cin, 128) * cs
        y_blk = tb * _round_up(N, sub_o) * Cp * osz
        wfc = _round_up(Cin, sub_c) * J * Cp * cs
        bias = 8 * 128 * 4
        stats = 2 * 8 * Cp * 4
        # single-buffered in-kernel temporaries: z (f32), zz scratch (f32),
        # zz cast (compute dtype), acc (f32)
        npad = _round_up(N, 8)
        tmp = (tb * npad * J * Cp * 4            # z
               + tb * _round_up(NJ, 8) * Cp * (4 + cs)   # scratch + cast
               + tb * npad * Cp * 4)             # acc
        # every BlockSpec'd operand is double-buffered by the pipeline
        return 2 * (w_blk + x_blk + y_blk + wfc + bias + stats) + tmp

    best = 1
    for tb in range(1, B + 1):
        if footprint(tb) > vmem_budget_bytes:
            break
        best = tb
        if tb * N >= max_rows:
            break
    return best


def gconv_forward(W, x, fc_weight, fc_bias, bn_gamma, bn_beta, *, J,
                  bn_bool=True, eps=1e-5, compute_dtype=jnp.bfloat16):
    """W: (B, N, N, J) (module layout).  x: (B, N, Cin).
    Returns (W, y) with y: (B, N, Cout) float32, matching the PyTorch forward
    (BatchNorm1d in training mode)."""
    B, N, N2, Jw = W.shape
    assert N == N2 and Jw == J
    Cin = x.shape[-1]
    Cout = fc_weight.shape[0]
    Cp = _round_up(Cout, 128)                    # lane-dense output channels

    compute_dtype = np.dtype(compute_dtype)
    is_f32 = compute_dtype == np.dtype(np.float32)
    # bf16 pre-BN writeback halves HBM traffic of the largest intermediate;
    # the f32 path keeps f32 end-to-end for tight parity checks.
    out_dtype = np.dtype(np.float32) if is_f32 else np.dtype(jnp.bfloat16)

    # W (B,N,N,J) -> (B,N,J,N) -> (B, N, J*N), fused with the compute-dtype
    # cast (one HBM pass which the cast needs anyway).
    W2 = jnp.transpose(W, (0, 1, 3, 2)).reshape(B, N, J * N).astype(compute_dtype)
    xc = x.astype(compute_dtype)

    # fc weight regrouped so one (Cin, J*Cp) matmul computes every z_j:
    #   wfc2[f, j*Cp + c] = fc_weight[c, j*Cin + f]; padded channels are zero.
    fcw = jnp.pad(fc_weight.reshape(Cout, J, Cin),
                  ((0, Cp - Cout), (0, 0), (0, 0)))
    wfc2 = jnp.transpose(fcw, (2, 1, 0)).reshape(Cin, J * Cp).astype(compute_dtype)
    bias = jnp.pad(fc_bias.astype(jnp.float32), (0, Cp - Cout)).reshape(1, Cp)

    # Generation-aware VMEM limit and block-size selection.
    vmem_phys, n_cores = _tpu_vmem_and_cores()
    if vmem_phys >= 128 * _MiB:          # v5e / v6e (128 MiB, single TC)
        vmem_limit = 96 * _MiB
    else:                                # v7x (64 MiB per TC)
        vmem_limit = min(48 * _MiB, (vmem_phys * 3) // 4)
    TB = _pick_graphs_per_block(B, N, J, Cin, Cp, compute_dtype, out_dtype,
                                vmem_budget_bytes=int(0.4 * vmem_limit))
    if n_cores > 1:                      # keep >=2 grid steps so both TCs work
        TB = min(TB, max(1, -(-B // n_cores)))
    nb = -(-B // TB)
    B_pad = nb * TB
    if B_pad != B:                       # zero-padded graphs: exact no-ops
        W2 = jnp.pad(W2, ((0, B_pad - B), (0, 0), (0, 0)))
        xc = jnp.pad(xc, ((0, B_pad - B), (0, 0), (0, 0)))

    precision = (jax.lax.Precision.HIGHEST if is_f32
                 else jax.lax.Precision.DEFAULT)

    y, psum, psumsq = pl.pallas_call(
        functools.partial(_gconv_fc_kernel, precision=precision, J=J),
        grid=(nb,),
        in_specs=[
            pl.BlockSpec((TB, N, J * N), lambda b: (b, 0, 0)),
            pl.BlockSpec((TB, N, Cin), lambda b: (b, 0, 0)),
            pl.BlockSpec((Cin, J * Cp), lambda b: (0, 0)),
            pl.BlockSpec((1, Cp), lambda b: (0, 0)),
        ],
        out_specs=(
            pl.BlockSpec((TB, N, Cp), lambda b: (b, 0, 0)),
            pl.BlockSpec((1, 1, Cp), lambda b: (b, 0, 0)),
            pl.BlockSpec((1, 1, Cp), lambda b: (b, 0, 0)),
        ),
        out_shape=(
            jax.ShapeDtypeStruct((B_pad, N, Cp), out_dtype),
            jax.ShapeDtypeStruct((nb, 1, Cp), jnp.float32),
            jax.ShapeDtypeStruct((nb, 1, Cp), jnp.float32),
        ),
        scratch_shapes=[pltpu.VMEM((TB, J * N, Cp), jnp.float32)],
        compiler_params=pltpu.CompilerParams(
            dimension_semantics=("parallel",),
            vmem_limit_bytes=int(vmem_limit)),
    )(W2, xc, wfc2, bias)

    y = y[:B, :, :Cout].astype(jnp.float32)

    if not bn_bool:
        return W, y

    # Combine per-block partial stats (tiny (nb, Cout) reduction).  Stats were
    # accumulated on (y - bias), so padded graphs/channels contributed zero.
    count = float(B * N)
    s1 = jnp.sum(psum[:, 0, :Cout], axis=0)
    s2 = jnp.sum(psumsq[:, 0, :Cout], axis=0)
    mean_c = s1 / count
    var = jnp.maximum(s2 / count - mean_c * mean_c, 0.0)   # biased, as torch BN
    mean = mean_c + fc_bias.astype(jnp.float32)
    scale = bn_gamma.astype(jnp.float32) / jnp.sqrt(var + eps)
    shift = bn_beta.astype(jnp.float32) - mean * scale
    # Trivially memory-bound per-channel scale-and-shift: leave it to XLA
    # (it fuses into neighbours; a Pallas pass would only add launch +
    # masked-store overhead for Cout < 128).
    y = y * scale + shift
    return W, y


def gconv_reference(W, x, fc_weight, fc_bias, bn_gamma, bn_beta, *, J,
                    bn_bool=True, eps=1e-5):
    """Pure-JAX f32 reference mirroring the PyTorch forward."""
    B, N = W.shape[0], W.shape[1]
    gm = jnp.einsum('bnmj,bmf->bnjf', W, x).reshape(B, N, -1)   # gmul
    y = gm @ fc_weight.T + fc_bias                              # fc
    if bn_bool:
        flat = y.reshape(B * N, -1)
        mean = flat.mean(axis=0)
        var = ((flat - mean) ** 2).mean(axis=0)
        flat = (flat - mean) / jnp.sqrt(var + eps) * bn_gamma + bn_beta
        y = flat.reshape(B, N, -1)
    return W, y


if __name__ == "__main__":
    # small shapes consistent with the module:
    #   B graphs, N nodes, J adjacency operators, nf_input/nf_output features
    B, N, J = 2, 8, 2
    nf_input, nf_output = 16, 32
    num_inputs = J * nf_input

    key = jax.random.PRNGKey(0)
    kW, kx, kw, kb = jax.random.split(key, 4)

    W = jax.random.normal(kW, (B, N, N, J), dtype=jnp.float32)
    x = jax.random.normal(kx, (B, N, nf_input), dtype=jnp.float32)

    # deterministic params (nn.Linear-style init; BN affine gamma=1, beta=0)
    bound = 1.0 / np.sqrt(num_inputs)
    fc_weight = jax.random.uniform(kw, (nf_output, num_inputs),
                                   minval=-bound, maxval=bound,
                                   dtype=jnp.float32)
    fc_bias = jax.random.uniform(kb, (nf_output,),
                                 minval=-bound, maxval=bound,
                                 dtype=jnp.float32)
    bn_gamma = jnp.ones((nf_output,), dtype=jnp.float32)
    bn_beta = jnp.zeros((nf_output,), dtype=jnp.float32)

    _, y_ref = gconv_reference(W, x, fc_weight, fc_bias, bn_gamma, bn_beta, J=J)

    # 1) f32 compute path: tight check of the kernel algebra / fused BN stats.
    W_out, y_f32 = gconv_forward(W, x, fc_weight, fc_bias, bn_gamma, bn_beta,
                                 J=J, compute_dtype=jnp.float32)
    jax.block_until_ready(y_f32)
    np.testing.assert_allclose(np.asarray(y_f32), np.asarray(y_ref),
                               rtol=1e-3, atol=1e-3)

    # 2) bf16 MXU operands + bf16 pre-BN writeback (performance configuration):
    #    tolerance sized for bf16 input/intermediate rounding (accum stays f32).
    W_out, y_bf16 = gconv_forward(W, x, fc_weight, fc_bias, bn_gamma, bn_beta,
                                  J=J, compute_dtype=jnp.bfloat16)
    jax.block_until_ready(y_bf16)
    np.testing.assert_allclose(np.asarray(y_bf16), np.asarray(y_ref),
                               rtol=5e-2, atol=8e-2)

    assert y_bf16.shape == (B, N, nf_output)
    assert W_out.shape == (B, N, N, J)

    print("KERNEL_OK")
</pallas_src>

<mosaic_0001>
module attributes {stable_mosaic.version = 11 : i64} {
  func.func @_gconv_fc_kernel(%arg0: i32, %arg1: memref<1x8x16xf32, #tpu.memory_space<vmem>>, %arg2: memref<1x8x16xf32, #tpu.memory_space<vmem>>, %arg3: memref<16x256xf32, #tpu.memory_space<vmem>>, %arg4: memref<1x128xf32, #tpu.memory_space<vmem>>, %arg5: memref<1x8x128xf32, #tpu.memory_space<vmem>>, %arg6: memref<1x1x128xf32, #tpu.memory_space<vmem>>, %arg7: memref<1x1x128xf32, #tpu.memory_space<vmem>>, %arg8: memref<1x16x128xf32, #tpu.memory_space<vmem>>) attributes {dimension_semantics = [#tpu.dimension_semantics<parallel>], iteration_bounds = array<i64: 2>, scalar_prefetch = 0 : i64, scratch_operands = 1 : i64, tpu.core_type = #tpu.core_type<tc>, window_params = [{transform_indices = @transform_0, window_bounds = array<i64: 1, 8, 16>}, {transform_indices = @transform_1, window_bounds = array<i64: 1, 8, 16>}, {pipeline_mode = #tpu.pipeline_mode<synchronous>, transform_indices = @transform_2, window_bounds = array<i64: 16, 256>}, {pipeline_mode = #tpu.pipeline_mode<synchronous>, transform_indices = @transform_3, window_bounds = array<i64: 1, 128>}, {transform_indices = @transform_4, window_bounds = array<i64: 1, 8, 128>}, {transform_indices = @transform_5, window_bounds = array<i64: 1, 1, 128>}, {transform_indices = @transform_6, window_bounds = array<i64: 1, 1, 128>}]} {
    %c0 = arith.constant 0 : index
    %c0_0 = arith.constant 0 : index
    %c0_1 = arith.constant 0 : index
    %0 = vector.load %arg2[%c0, %c0_0, %c0_1] : memref<1x8x16xf32, #tpu.memory_space<vmem>>, vector<1x8x16xf32>
    %1 = vector.shape_cast %0 : vector<1x8x16xf32> to vector<8x16xf32>
    %c0_2 = arith.constant 0 : index
    %c0_3 = arith.constant 0 : index
    %2 = vector.load %arg3[%c0_2, %c0_3] : memref<16x256xf32, #tpu.memory_space<vmem>>, vector<16x256xf32>
    %cst = arith.constant dense<0.000000e+00> : vector<8x256xf32>
    %3 = tpu.matmul %1, %2, %cst {dimension_numbers = #tpu.dot_dimension_numbers<[1], [0], [0], [1], [0, 0, 1, 1], [], []>, precision = #tpu.contract_precision<fp32>} : vector<8x16xf32>, vector<16x256xf32>, vector<8x256xf32> -> vector<8x256xf32>
    %4 = vector.extract_strided_slice %3 {offsets = [0, 0], sizes = [8, 128], strides = [1, 1]} : vector<8x256xf32> to vector<8x128xf32>
    %5 = vector.shape_cast %4 : vector<8x128xf32> to vector<1x8x128xf32>
    %c0_4 = arith.constant 0 : index
    %c0_5 = arith.constant 0 : index
    %c0_6 = arith.constant 0 : index
    %6 = vector.load %arg8[%c0_4, %c0_5, %c0_6] : memref<1x16x128xf32, #tpu.memory_space<vmem>>, vector<1x8x128xf32>
    tpu.vector_store %arg8[%c0_4, %c0_5, %c0_6], %5 {strides = array<i32>} : memref<1x16x128xf32, #tpu.memory_space<vmem>>, vector<1x8x128xf32>,
    %7 = vector.extract_strided_slice %3 {offsets = [0, 128], sizes = [8, 128], strides = [1, 1]} : vector<8x256xf32> to vector<8x128xf32>
    %8 = vector.shape_cast %7 : vector<8x128xf32> to vector<1x8x128xf32>
    %c0_7 = arith.constant 0 : index
    %c8 = arith.constant 8 : index
    %c0_8 = arith.constant 0 : index
    %9 = vector.load %arg8[%c0_7, %c8, %c0_8] : memref<1x16x128xf32, #tpu.memory_space<vmem>>, vector<1x8x128xf32>
    tpu.vector_store %arg8[%c0_7, %c8, %c0_8], %8 {strides = array<i32>} : memref<1x16x128xf32, #tpu.memory_space<vmem>>, vector<1x8x128xf32>,
    %c0_9 = arith.constant 0 : index
    %c0_10 = arith.constant 0 : index
    %c0_11 = arith.constant 0 : index
    %10 = vector.load %arg8[%c0_9, %c0_10, %c0_11] : memref<1x16x128xf32, #tpu.memory_space<vmem>>, vector<1x16x128xf32>
    %c0_12 = arith.constant 0 : index
    %c0_13 = arith.constant 0 : index
    %c0_14 = arith.constant 0 : index
    %11 = vector.load %arg1[%c0_12, %c0_13, %c0_14] : memref<1x8x16xf32, #tpu.memory_space<vmem>>, vector<1x8x16xf32>
    "tpu.trace_start"() <{level = 10 : i32, message = "bnk,bkc->bnc"}> : () -> ()
    %cst_15 = arith.constant dense<0.000000e+00> : vector<1x8x128xf32>
    %12 = tpu.matmul %11, %10, %cst_15 {dimension_numbers = #tpu.dot_dimension_numbers<[2], [1], [1], [2], [0, 0, 0, 1, 1, 2], [0], [0]>, precision = #tpu.contract_precision<fp32>} : vector<1x8x16xf32>, vector<1x16x128xf32>, vector<1x8x128xf32> -> vector<1x8x128xf32>
    "tpu.trace_stop"() : () -> ()
    %c0_16 = arith.constant 0 : index
    %c0_17 = arith.constant 0 : index
    %13 = vector.load %arg4[%c0_16, %c0_17] : memref<1x128xf32, #tpu.memory_space<vmem>>, vector<1x128xf32>
    %14 = vector.shape_cast %13 : vector<1x128xf32> to vector<1x1x128xf32>
    %15 = vector.broadcast %14 : vector<1x1x128xf32> to vector<1x8x128xf32>
    %16 = arith.addf %12, %15 : vector<1x8x128xf32>
    %c0_18 = arith.constant 0 : index
    %c0_19 = arith.constant 0 : index
    %c0_20 = arith.constant 0 : index
    %17 = vector.load %arg5[%c0_18, %c0_19, %c0_20] : memref<1x8x128xf32, #tpu.memory_space<vmem>>, vector<1x8x128xf32>
    tpu.vector_store %arg5[%c0_18, %c0_19, %c0_20], %16 {strides = array<i32>} : memref<1x8x128xf32, #tpu.memory_space<vmem>>, vector<1x8x128xf32>,
    %cst_21 = arith.constant dense<0.000000e+00> : vector<128xf32>
    %18 = vector.multi_reduction <add>, %12, %cst_21 [0, 1] : vector<1x8x128xf32> to vector<128xf32>
    %19 = vector.shape_cast %18 : vector<128xf32> to vector<1x1x128xf32>
    %c0_22 = arith.constant 0 : index
    %c0_23 = arith.constant 0 : index
    %c0_24 = arith.constant 0 : index
    %20 = vector.load %arg6[%c0_22, %c0_23, %c0_24] : memref<1x1x128xf32, #tpu.memory_space<vmem>>, vector<1x1x128xf32>
    tpu.vector_store %arg6[%c0_22, %c0_23, %c0_24], %19 {strides = array<i32>} : memref<1x1x128xf32, #tpu.memory_space<vmem>>, vector<1x1x128xf32>,
    %21 = arith.mulf %12, %12 : vector<1x8x128xf32>
    %cst_25 = arith.constant dense<0.000000e+00> : vector<128xf32>
    %22 = vector.multi_reduction <add>, %21, %cst_25 [0, 1] : vector<1x8x128xf32> to vector<128xf32>
    %23 = vector.shape_cast %22 : vector<128xf32> to vector<1x1x128xf32>
    %c0_26 = arith.constant 0 : index
    %c0_27 = arith.constant 0 : index
    %c0_28 = arith.constant 0 : index
    %24 = vector.load %arg7[%c0_26, %c0_27, %c0_28] : memref<1x1x128xf32, #tpu.memory_space<vmem>>, vector<1x1x128xf32>
    tpu.vector_store %arg7[%c0_26, %c0_27, %c0_28], %23 {strides = array<i32>} : memref<1x1x128xf32, #tpu.memory_space<vmem>>, vector<1x1x128xf32>,
    return
  }
  func.func @transform_0(%arg0: i32) -> (i32, i32, i32) {
    %c0_i32 = arith.constant 0 : i32
    %c0_i32_0 = arith.constant 0 : i32
    %c0_i32_1 = arith.constant 0 : i32
    return %arg0, %c0_i32, %c0_i32_0 : i32, i32, i32
  }
  func.func @transform_1(%arg0: i32) -> (i32, i32, i32) {
    %c0_i32 = arith.constant 0 : i32
    %c0_i32_0 = arith.constant 0 : i32
    %c0_i32_1 = arith.constant 0 : i32
    return %arg0, %c0_i32, %c0_i32_0 : i32, i32, i32
  }
  func.func @transform_2(%arg0: i32) -> (i32, i32) {
    %c0_i32 = arith.constant 0 : i32
    %c0_i32_0 = arith.constant 0 : i32
    %c0_i32_1 = arith.constant 0 : i32
    return %c0_i32, %c0_i32_0 : i32, i32
  }
  func.func @transform_3(%arg0: i32) -> (i32, i32) {
    %c0_i32 = arith.constant 0 : i32
    %c0_i32_0 = arith.constant 0 : i32
    %c0_i32_1 = arith.constant 0 : i32
    return %c0_i32, %c0_i32_0 : i32, i32
  }
  func.func @transform_4(%arg0: i32) -> (i32, i32, i32) {
    %c0_i32 = arith.constant 0 : i32
    %c0_i32_0 = arith.constant 0 : i32
    %c0_i32_1 = arith.constant 0 : i32
    return %arg0, %c0_i32, %c0_i32_0 : i32, i32, i32
  }
  func.func @transform_5(%arg0: i32) -> (i32, i32, i32) {
    %c0_i32 = arith.constant 0 : i32
    %c0_i32_0 = arith.constant 0 : i32
    %c0_i32_1 = arith.constant 0 : i32
    return %arg0, %c0_i32, %c0_i32_0 : i32, i32, i32
  }
  func.func @transform_6(%arg0: i32) -> (i32, i32, i32) {
    %c0_i32 = arith.constant 0 : i32
    %c0_i32_0 = arith.constant 0 : i32
    %c0_i32_1 = arith.constant 0 : i32
    return %arg0, %c0_i32, %c0_i32_0 : i32, i32, i32
  }
}

</mosaic_0001>

<bundles_post_ra>
// kernel: tpu_custom_call.1
= control target key start
LH: loop header
LB: loop body
LE: loop exit
PB: predicated region body
PF: predicated region fallthrough
CT: control target
= control target key end

     0   :  { %s2267_s0 = inlined_call_operand.hbm [shape: f32[2,8,16], index: 0, kind: input, shape index: {}]   ;;  %s2268_s1 = inlined_call_operand.hbm [shape: f32[2,8,16], index: 1, kind: input, shape index: {}]   ;;  %s2269_s2 = inlined_call_operand.hbm [shape: f32[16,256], index: 2, kind: input, shape index: {}]   ;;  %s2270_s3 = inlined_call_operand.vmem [shape: f32[1,128], index: 3, kind: input, shape index: {}]   ;;  %s2271_s4 = inlined_call_operand.hbm [shape: f32[2,8,128], index: 4, kind: output, shape index: {0}]   ;;  %s2272_s5 = inlined_call_operand.hbm [shape: f32[2,1,128], index: 5, kind: output, shape index: {1}]   ;;  %s2273_s6 = inlined_call_operand.hbm [shape: f32[2,1,128], index: 6, kind: output, shape index: {2}]  }
   0x1   :  { %2280 = sst [smem:[#allocation20_spill]] %s2269_s2 }
   0x2   :  { %12 = vsyncpa [#allocation4], 0 }
   0x3   :  { %14 = vsyncpa [#allocation4 + $0x1], 0 }
   0x4   :  { %15 = vsyncpa [#allocation7], 0 }
   0x5   :  { %17 = vsyncpa [#allocation7 + $0x1], 0 }
   0x6   :  { %18 = vsyncpa [#allocation5], 0 }
   0x7   :  { %20 = vsyncpa [#allocation5 + $0x1], 0 }
   0x8   :  { %21 = vsyncpa [#allocation11], 0 }
   0x9   :  { %23 = vsyncpa [#allocation11 + $0x1], 0  ;;  %s1941_s21 = smov 0   ;;  %s1943_s22 = smov 0  }
   0xa   :  { %s1945_s23 = smov 0   ;;  %s1947_s24 = smov 0  }
   0xb LB: > { %2281 = sst [smem:[#allocation18_spill]] %s1890_s23  ;;  %s1962_s25 = sadd.s32 4294967295, %s1894_s24   ;;  %s1894_s24 = sphi %s1947_s24, %s2303_s24   ;;  %s1890_s23 = sphi %s1945_s23, %s2300_s23   ;;  %s1886_s22 = sphi %s1943_s22, %s2302_s22   ;;  %s1882_s21 = sphi %s1941_s21, %s2301_s21  }
   0xc   : > { %s2274_s26 = sadd.s32 4294967294, %s1894_s24   ;;  %p49_p0 = scmp.ne.s32.totalorder %s1886_s22, %s1882_s21 }
   0xd   : > { %p2276_p1 = scmp.eq.s32.totalorder %s1962_s25, 0  ;;  %p147_p3 = scmp.eq.s32.totalorder %s2274_s26, 1 }
   0xe   : > { %p1529_p5 = scmp.ge.s32.totalorder %s1894_s24, 1  ;;  %p206_p7 = scmp.lt.s32.totalorder %s1894_s24, 3 }
   0xf   : > { %p1973_p4 = por %p2276_p1, %p49_p0  ;;  %p1978_p6 = por %p147_p3, %p49_p0 }
  0x10   : > { %p1983_p8 = pnand %p1529_p5, %p206_p7  ;;  %s1896_s30 = smov [#allocation8]  }
  0x11   : > { %s2282_s27 = scalar_select %p1973_p4, 1, 0 }
  0x12   : > { %s2283_s28 = scalar_select %p1978_p6, 1, 0 }
  0x13   : > { %s2284_s29 = scalar_select %p1983_p8, 1, 0 }
  0x14   : > { %s218_s7 = sshll.u32 %s1896_s30, 4  ;;  %p1622_p9 = pneg %p1983_p8  ;;  %s219_s7 = int_to_ptr.vmem [resolvable:$true] %s218_s7 }
  0x15   : > { %s1997_s9 = sadd.s32 1, %s1894_s24   ;;  %s36_s10 = sadd.s32 1, %s1890_s23 }
  0x16   : > { %p1992_p11 = pnand %p1622_p9, %p2276_p1  ;;  %s33_s11 = ssub.s32 %s1894_s24, %s1997_s9 }
  0x17   : > { %s1695_s12 = scalar_lea.vmem %s219_s7, 512  ;;  %p1703_p5 = scmp.lt.s32.totalorder %s219_s7, %s219_s7 }
  0x18   : > { %p1686_p12 = pneg %p1992_p11  ;;  %p1696_p13 = scmp.ne.s32.totalorder %s219_s7, %s1695_s12 }
  0x19   : > { %p1704_p7 = scmp.lt.s32.totalorder %s1695_s12, %s1695_s12 }
  0x1a   : > { %p1698_p0 = pnand %p1696_p13, %p1686_p12 }
  0x1b   : > { %p1705_p10 = por %p1704_p7, %p1703_p5 }
  0x1c   : > { %p1699_p3 = pneg %p1698_p0 }
  0x1e   : > { %p1706_p2 = pnand %p1705_p10, %p1699_p3 }
  0x20   : > { %1709 = shalt.err (!%p1706_p2)
}
  0x21   : > { %s1897_s13 = smov 256   ;;  %s1898_s14 = smov 16  }
  0x22   : > { %s2286_s2 = sld [smem:[#allocation20_spill]]  ;;  %p34_p9 = scmp.eq.s32.totalorder %s33_s11, 0 }
  0x23   : > { %p43_p12 = scmp.ne.s32.totalorder %s1890_s23, %s1886_s22  ;;  %p44_p10 = scmp.eq.s32.totalorder %s1894_s24, 0 }
  0x24   : > { %p1644_p2 = scmp.lt.s32.totalorder %s1894_s24, 2  ;;  %p2288_p0 = scmp.eq.s32.totalorder %s1962_s25, 1 }
  0x25   : > { %s2014_s17 = scalar_select %p34_p9, %s1890_s23, %s36_s10  }
  0x26   : > { %p45_p13 = por %p44_p10, %p43_p12  ;;  %p2018_p3 = por %p2288_p0, %p43_p12 }
  0x27   : > { %2287 = sst [smem:[#allocation19_spill]] %s2014_s17  ;;  %s235_s19 = sand.u32 1, %s1890_s23  }
  0x28   : > { %1625 = dma.hbm_to_vmem [thread:$0]  (!%p1992_p11), %s2286_s2, 512, %s219_s7, [#allocation7], %s1897_s13, %s1897_s13, %s1898_s14  }
  0x29   : > { %s2289_s18 = scalar_select %p2018_p3, 1, 0 }
  0x2a   : > { %s1533_s20 = sshll.u32 %s1894_s24, 7  ;;  %s2024_s30 = sshll.u32 %s235_s19, 3 }
  0x2b   : > { %s2029_s7 = scalar_lea.hbm %s2267_s0, %s1533_s20  ;;  %s239_s10 = scalar_lea.vmem [#allocation3], %s2024_s30 }
  0x2c   : > { %s246_s11 = sshll.u32 %s239_s10, 4  ;;  %p2032_p11 = pnand %p1644_p2, %p45_p13  ;;  %s247_s11 = int_to_ptr.vmem [resolvable:$true] %s246_s11 }
  0x2d   : > { %s2039_s16 = scalar_lea.hbm %s2268_s1, %s1533_s20  ;;  %s236_s8 = scalar_lea.sflag [#allocation4], %s235_s19 }
  0x2e   : > { %s1710_s12 = scalar_lea.hbm %s2029_s7, 128  ;;  %p1712_p7 = pneg %p2032_p11 }
  0x2f   : > { %p1711_p5 = scmp.ne.s32.totalorder %s2029_s7, %s1710_s12  ;;  %s1715_s2 = scalar_lea.hbm %s2267_s0, 256 }
  0x30   : > { %p1716_p10 = scmp.lt.s32.totalorder %s2029_s7, %s2267_s0  ;;  %p1717_p2 = scmp.lt.s32.totalorder %s1715_s2, %s1710_s12 }
  0x31   : > { %p1713_p9 = pnand %p1712_p7, %p1711_p5 }
  0x32   : > { %p1718_p13 = por %p1717_p2, %p1716_p10 }
  0x33   : > { %p1714_p12 = pneg %p1713_p9 }
  0x35   : > { %p1719_p0 = pnand %p1718_p13, %p1714_p12 }
  0x37   : > { %1722 = shalt.err (!%p1719_p0)
}
  0x38   : > { %s1723_s19 = scalar_lea.vmem %s247_s11, 128  ;;  %s1899_s20 = smov [#allocation3]  }
  0x39   : > { %p1724_p1 = scmp.ne.s32.totalorder %s247_s11, %s1723_s19  ;;  %s1728_s14 = sshll.u32 %s1899_s20, 4  ;;  %s1729_s14 = int_to_ptr.vmem [resolvable:$false] %s1728_s14 }
  0x3a   : > { %s1730_s26 = scalar_lea.vmem %s1729_s14, 256  ;;  %p1731_p9 = scmp.lt.s32.totalorder %s247_s11, %s1729_s14 }
  0x3b   : > { %p1726_p6 = pnand %p1724_p1, %p1712_p7  ;;  %p1732_p3 = scmp.lt.s32.totalorder %s1730_s26, %s1723_s19 }
  0x3d   : > { %p1727_p5 = pneg %p1726_p6  ;;  %p1733_p4 = por %p1732_p3, %p1731_p9 }
  0x3f   : > { %p1734_p8 = pnand %p1733_p4, %p1727_p5 }
  0x41   : > { %1737 = shalt.err (!%p1734_p8)
}
  0x42   : > { %1629 = dma.hbm_to_vmem [thread:$0]  (!%p2032_p11), %s2029_s7, 128, %s247_s11, %s236_s8  }
  0x43   : > { %s253_s2 = sand.u32 1, %s1894_s24   ;;  %s257_s23 = scalar_lea.vmem [#allocation6], %s2024_s30 }
  0x44   : > { %s264_s17 = sshll.u32 %s257_s23, 4  ;;  %s254_s15 = scalar_lea.sflag [#allocation7], %s253_s2  ;;  %s265_s17 = int_to_ptr.vmem [resolvable:$true] %s264_s17 }
  0x45   : > { %s1738_s12 = scalar_lea.hbm %s2039_s16, 128  ;;  %s1743_s20 = scalar_lea.hbm %s2268_s1, 256 }
  0x46   : > { %p1739_p1 = scmp.ne.s32.totalorder %s2039_s16, %s1738_s12  ;;  %p1744_p8 = scmp.lt.s32.totalorder %s2039_s16, %s2268_s1 }
  0x47   : > { %p1745_p3 = scmp.lt.s32.totalorder %s1743_s20, %s1738_s12 }
  0x48   : > { %p1741_p4 = pnand %p1739_p1, %p1712_p7 }
  0x49   : > { %p1746_p12 = por %p1745_p3, %p1744_p8 }
  0x4a   : > { %p1742_p6 = pneg %p1741_p4 }
  0x4c   : > { %p1747_p10 = pnand %p1746_p12, %p1742_p6 }
  0x4e   : > { %1750 = shalt.err (!%p1747_p10)
}
  0x4f   : > { %s1751_s30 = scalar_lea.vmem %s265_s17, 128  ;;  %s1900_s7 = smov [#allocation6]  }
  0x50   : > { %p1752_p2 = scmp.ne.s32.totalorder %s265_s17, %s1751_s30  ;;  %s1756_s11 = sshll.u32 %s1900_s7, 4  ;;  %s1757_s11 = int_to_ptr.vmem [resolvable:$false] %s1756_s11 }
  0x51   : > { %s1758_s8 = scalar_lea.vmem %s1757_s11, 256  ;;  %p1759_p5 = scmp.lt.s32.totalorder %s265_s17, %s1757_s11 }
  0x52   : > { %p1754_p13 = pnand %p1752_p2, %p1712_p7  ;;  %p1760_p9 = scmp.lt.s32.totalorder %s1758_s8, %s1751_s30 }
  0x54   : > { %p1755_p0 = pneg %p1754_p13  ;;  %p1761_p1 = por %p1760_p9, %p1759_p5 }
  0x56   : > { %p1762_p4 = pnand %p1761_p1, %p1755_p0 }
  0x58   : > { %1765 = shalt.err (!%p1762_p4)
}
  0x59   : > { %1632 = dma.hbm_to_vmem [thread:$0]  (!%p2032_p11), %s2039_s16, 128, %s265_s17, %s254_s15  }
  0x5a   : > { %p2291_p6 = scmp.ne.s32.totalorder %s2284_s29, 0 }
  0x5b   : > { %s2084_s2 = sand.u32 (!%p2291_p6), 1, %s1886_s22   ;;  %p2292_p7 = scmp.ne.s32.totalorder (!%p2291_p6), %s2282_s27, 0 }
  0x5c   : > { %273 = sbr.rel (%p2291_p6) target bundleno = 605 (0x25d), region = 36  ;;  %s2087_s23 = sshll.u32 (!%p2291_p6), %s2084_s2, 3 }
  0x5d   : > { %s276_s12 = scalar_lea.sflag (!%p2291_p6), [#allocation4], %s2084_s2  ;;  %s279_s10 = scalar_lea.vmem (!%p2291_p6), [#allocation3], %s2087_s23 }
  0x61   : > { %1861 = dma.done.wait (%p2292_p7), %s276_s12, 128  }
  0x62   : > { %1863 = vsyncadd (%p2292_p7), %s276_s12, 4294967168  ;;  %s284_s29 = sand.u32 1, %s1962_s25   ;;  %s288_s16 = scalar_lea.vmem [#allocation6], %s2087_s23 }
  0x63   : > { %s285_s13 = scalar_lea.sflag [#allocation7], %s284_s29 }
  0x64   : > { %1865 = dma.done.wait (%p2292_p7), %s285_s13, 128  }
  0x65   : > { %1867 = vsyncadd (%p2292_p7), %s285_s13, 4294967168  ;;  %p2293_p11 = scmp.eq.s32.totalorder %s1962_s25, 0 }
  0x67   : > { %1869 = dma.done.wait (%p2293_p11), [#allocation7], 512   ;;  %p2294_p8 = pmov %p2293_p11 }
  0x68   : > { %v1901_v0 = vmov 0.0   ;;  %vm339_vm0 = vcmask 130048   ;;  %v338_v1 = vld [vmem:[#allocation8 + $0x18] sm:$0xff]  ;;  %v337_v2 = vld [vmem:[#allocation8 + $0x10] sm:$0xff]  ;;  %v336_v3 = vld [vmem:[#allocation8 + $0x8] sm:$0xff]  ;;  %vm1902_vm1 = vmmov 0  }
  0x69   : > { %1871 = vsyncadd (%p2294_p8), [#allocation7], 4294966784  ;;  %411 = vmatprep.mubr.f32.mxu0 %v1901_v0  ;;  %507 = vmatprep.mubr.f32.mxu1 %v1901_v0  ;;  %v371_v4 = vand.u32 4294901760, %v338_v1  ;;  %v373_v5 = vand.u32 4294901760, %v337_v2  ;;  %v375_v6 = vand.u32 4294901760, %v336_v3  ;;  %v335_v7 = vld [vmem:[#allocation8] sm:$0xff] }
  0x6a   : > { %v334_v8 = vld [vmem:[%s288_s16] sm:$0xff]  ;;  %v377_v9 = vand.u32 4294901760, %v335_v7  ;;  %v838_v32 = vld [vmem:[%s279_s10] sm:$0xff]  ;;  %s1543_s15 = sshll.u32 %s1962_s25, 7  ;;  %s321_s19 = scalar_lea.vmem [#allocation9], %s2087_s23 }
  0x6b   : > { %v341_v10 = vsel %vm339_vm0, %v334_v8, 0  ;;  %372 = vmatprep.subr.mxu0 %v371_v4  ;;  %v452_v11 = vsub.f32 %v338_v1, %v371_v4  ;;  %v458_v13 = vsub.f32 %v337_v2, %v373_v5  ;;  %v464_v14 = vsub.f32 %v336_v3, %v375_v6  ;;  %s1347_s20 = sshll.u32 %s321_s19, 4  ;;  %s2155_s30 = scalar_lea.hbm %s2271_s4, %s1543_s15  ;;  %s2157_s20 = int_to_ptr.vmem [resolvable:$true] %s1347_s20 }
  0x6c   : > { %v412_v12 = vand.u32 4294901760, %v341_v10  ;;  %374 = vmatpush1.msra.mxu0 %v373_v5  ;;  %v470_v15 = vsub.f32 %v335_v7, %v377_v9  ;;  %v840_v34 = vsel %vm339_vm0, %v838_v32, 0  ;;  %s1326_s7 = scalar_lea.sflag [#allocation5], %s2084_s2  ;;  %s1766_s11 = scalar_lea.vmem %s2157_s20, 128 }
  0x6d   : > { %376 = vmatprep.subr.mxu0 %v375_v6  ;;  %v453_v16 = vand.u32 4294901760, %v452_v11  ;;  %v459_v18 = vand.u32 4294901760, %v458_v13  ;;  %v465_v19 = vand.u32 4294901760, %v464_v14  ;;  %v2123_v38 = vand.u32 4294901760, %v840_v34  ;;  %p1767_p3 = scmp.ne.s32.totalorder %s2157_s20, %s1766_s11  ;;  %p2295_p12 = scmp.ne.s32.totalorder %s2289_s18, 0 }
  0x6e   : > { %v413_v17 = vsub.f32 %v341_v10, %v412_v12  ;;  %378 = vmatpush1.msra.mxu0 %v377_v9  ;;  %v471_v20 = vand.u32 4294901760, %v470_v15  ;;  %s1903_s8 = smov [#allocation9]  }
  0x6f   : > { %v454_v21 = vsub.f32 %v452_v11, %v453_v16  ;;  %v460_v23 = vsub.f32 %v458_v13, %v459_v18  ;;  %545 = vmatprep.subr.mxu0 %v452_v11  ;;  %v466_v24 = vsub.f32 %v464_v14, %v465_v19  ;;  %v910_v46 = vsub.f32 %v840_v34, %v2123_v38  ;;  %p1768_p10 = pnand %p1767_p3, %p2295_p12  ;;  %s1770_s23 = sshll.u32 %s1903_s8, 4  ;;  %s1771_s23 = int_to_ptr.vmem [resolvable:$false] %s1770_s23 }
  0x70   : > { %v414_v22 = vand.u32 4294901760, %v413_v17  ;;  %v472_v25 = vsub.f32 %v470_v15, %v471_v20  ;;  %s1772_s12 = scalar_lea.vmem %s1771_s23, 256  ;;  %p1773_p13 = scmp.lt.s32.totalorder %s2157_s20, %s1771_s23 }
  0x71   : > { %v455_v26 = vand.u32 4294901760, %v454_v21  ;;  %v461_v28 = vand.u32 4294901760, %v460_v23  ;;  %v467_v29 = vand.u32 4294901760, %v466_v24  ;;  %v911_v53 = vand.u32 4294901760, %v910_v46  ;;  %p1769_p2 = pneg %p1768_p10  ;;  %p1774_p0 = scmp.lt.s32.totalorder %s1772_s12, %s1766_s11 }
  0x72   : > { %v415_v27 = vsub.f32 %v413_v17, %v414_v22  ;;  %v473_v30 = vand.u32 4294901760, %v472_v25 }
  0x73   : > { %456 = vmatprep.subr.mxu1 %v455_v26  ;;  %v912_v58 = vsub.f32 %v910_v46, %v911_v53  ;;  %p1775_p5 = por %p1774_p0, %p1773_p13 }
  0x74   : > { %v416_v31 = vand.u32 4294901760, %v415_v27  ;;  %462 = vmatpush1.msra.mxu1 %v461_v28 }
  0x75   : > { %468 = vmatprep.subr.mxu1 %v467_v29  ;;  %v913_v63 = vand.u32 4294901760, %v912_v58  ;;  %p1776_p9 = pnand %p1775_p5, %p1769_p2 }
  0x76   : > { %417 = vmatmul.mubr.f32.vlgmr.msra.gmra.mxu0 %v416_v31  ;;  %474 = vmatpush1.msra.mxu1 %v473_v30 }
  0x77   : > { %548 = vmatpush1.msra.mxu0 %v458_v13  ;;  %509 = vmatmul.mubr.f32.vlgmr.msra.gmra.mxu1 %v412_v12 }
  0x78   : > { %551 = vmatprep.subr.mxu0 %v464_v14  ;;  %587 = vmatprep.mubr.f32.mxu0 %v1901_v0 }
  0x79   : > { %554 = vmatpush1.msra.mxu0 %v470_v15  ;;  %625 = vmatprep.subr.mxu1 %v371_v4 }
  0x7a   : > { %590 = vmatmul.mubr.f32.vlgmr.msra.gmra.mxu0 %v413_v17  ;;  %627 = vmatpush1.msra.mxu1 %v373_v5 }
  0x7b   : > { %705 = vmatprep.subr.mxu0 %v453_v16  ;;  %629 = vmatprep.subr.mxu1 %v375_v6 }
  0x7c   : > { %709 = vmatpush1.msra.mxu0 %v459_v18  ;;  %631 = vmatpush1.msra.mxu1 %v377_v9 }
  0x7d   : > { %664 = vmatprep.mubr.f32.mxu1 %v1901_v0  ;;  %713 = vmatprep.subr.mxu0 %v465_v19 }
  0x7e   : > { %668 = vmatmul.mubr.f32.vlgmr.msra.gmra.mxu1 %v414_v22  ;;  %717 = vmatpush1.msra.mxu0 %v471_v20  ;;  %v1541_v22 = vld [vmem:[%s2270_s3] ss:$0 sm:$0xff] }
  0x7f   : > { %750 = vmatprep.mubr.f32.mxu0 %v1901_v0  ;;  %787 = vmatprep.subr.mxu1 %v371_v4 }
  0x80   : > { %752 = vmatmul.mubr.f32.vlgmr.msra.gmra.mxu0 %v412_v12  ;;  %789 = vmatpush1.msra.mxu1 %v373_v5 }
  0x81   : > { %826 = vmatprep.mubr.f32.mxu1 %v1901_v0  ;;  %791 = vmatprep.subr.mxu1 %v375_v6 }
  0x82   : > { %1566 = vmatprep.subr.mxu0 %v1901_v0  ;;  %793 = vmatpush1.msra.mxu1 %v377_v9 }
  0x83   : > { %828 = vmatmul.mubr.f32.vlgmr.msra.gmra.mxu1 %v412_v12  ;;  %1573 = vmatprep.subr.mxu1 %v1901_v0 }
  0x84   : > { %1570 = vmatprep.mubr.msk.f32.mxu0 %vm1902_vm1, %v1901_v0  ;;  %1577 = vmatprep.mubr.msk.f32.mxu1 %vm1902_vm1, %v1901_v0 }
 0x136   : > { %v418_v33 = vpop.f32.mrf.mxu0 }
 0x137   : > { %v510_v36 = vpop.f32.mrf.mxu1 }
 0x138   : > { %v420_v35 = vpop.f32.mrf.mxu0  ;;  %v511_v37 = vadd.f32 %v510_v36, %v418_v33 }
 0x139   : > { %v512_v40 = vpop.f32.mrf.mxu1 }
 0x13a   : > { %v591_v39 = vpop.f32.mrf.mxu0  ;;  %v513_v42 = vadd.f32 %v512_v40, %v420_v35 }
 0x13b   : > { %v592_v41 = vadd.f32 %v591_v39, %v511_v37 }
 0x13c   : > { %v593_v43 = vpop.f32.mrf.mxu0 }
 0x13d   : > { %v594_v44 = vadd.f32 %v593_v43, %v513_v42 }
 0x13e   : > { %v669_v45 = vpop.f32.mrf.mxu1 }
 0x13f   : > { %v670_v47 = vadd.f32 %v669_v45, %v592_v41 }
 0x140   : > { %v753_v48 = vpop.f32.mrf.mxu0  ;;  %v671_v49 = vpop.f32.mrf.mxu1 }
 0x141   : > { %v754_v50 = vadd.f32 %v753_v48, %v670_v47  ;;  %v672_v51 = vadd.f32 %v671_v49, %v594_v44 }
 0x142   : > { %v755_v52 = vpop.f32.mrf.mxu0 }
 0x143   : > { %v756_v54 = vadd.f32 %v755_v52, %v672_v51  ;;  %v829_v55 = vpop.f32.mrf.mxu1 }
 0x144   : > { %v830_v56 = vadd.f32 %v829_v55, %v754_v50 }
 0x145   : > { %v831_v57 = vpop.f32.mrf.mxu1 }
 0x146   : > { %v874_v59 = vand.u32 4294901760, %v830_v56  ;;  %v832_v60 = vadd.f32 %v831_v57, %v756_v54 }
 0x148   : > { %v956_v61 = vsub.f32 %v830_v56, %v874_v59  ;;  %v871_v62 = vand.u32 4294901760, %v832_v60 }
 0x14a   : > { %v957_v1 = vand.u32 4294901760, %v956_v61  ;;  %v949_v2 = vsub.f32 %v832_v60, %v871_v62  ;;  %1567 = vmatpush3.msra.mxu0 %v871_v62 }
 0x14b   : > { %1568 = vmatprep.subr.mxu0 %v1901_v0 }
 0x14c   : > { %v950_v3 = vand.u32 4294901760, %v949_v2  ;;  %1569 = vmatpush3.msra.mxu0 %v874_v59  ;;  %v958_v4 = vsub.f32 %v956_v61, %v957_v1 }
 0x14d   : > { %1580 = vmatprep.subr.mxu0 %v1901_v0  ;;  %1571 = vmatmul.mubr.f32.vlgmr.msra.gmra.mxu0 %v913_v63 }
 0x14e   : > { %v951_v5 = vsub.f32 %v949_v2, %v950_v3  ;;  %1581 = vmatpush3.msra.mxu0 %v949_v2  ;;  %1584 = vmatprep.mubr.msk.f32.mxu0 %vm1902_vm1, %v1901_v0  ;;  %v959_v7 = vand.u32 4294901760, %v958_v4 }
 0x14f   : > { %1582 = vmatprep.subr.mxu0 %v1901_v0 }
 0x150   : > { %1583 = vmatpush3.msra.mxu0 %v956_v61  ;;  %v952_v6 = vand.u32 4294901760, %v951_v5 }
 0x151   : > { %1594 = vmatprep.subr.mxu0 %v1901_v0  ;;  %1585 = vmatmul.mubr.f32.vlgmr.msra.gmra.mxu0 %v910_v46 }
 0x152   : > { %1574 = vmatpush3.msra.mxu1 %v952_v6  ;;  %1595 = vmatpush3.msra.mxu0 %v950_v3 }
 0x153   : > { %1575 = vmatprep.subr.mxu1 %v1901_v0  ;;  %1596 = vmatprep.subr.mxu0 %v1901_v0 }
 0x154   : > { %1576 = vmatpush3.msra.mxu1 %v959_v7  ;;  %1597 = vmatpush3.msra.mxu0 %v957_v1 }
 0x155   : > { %1578 = vmatmul.mubr.f32.vlgmr.msra.gmra.mxu1 %v2123_v38  ;;  %1587 = vmatprep.subr.mxu1 %v1901_v0 }
 0x156   : > { %1588 = vmatpush3.msra.mxu1 %v871_v62  ;;  %1591 = vmatprep.mubr.msk.f32.mxu1 %vm1902_vm1, %v1901_v0 }
 0x157   : > { %1589 = vmatprep.subr.mxu1 %v1901_v0  ;;  %1598 = vmatprep.mubr.msk.f32.mxu0 %vm1902_vm1, %v1901_v0 }
 0x158   : > { %1590 = vmatpush3.msra.mxu1 %v874_v59  ;;  %1599 = vmatmul.mubr.f32.vlgmr.msra.gmra.mxu0 %v2123_v38 }
 0x159   : > { %1592 = vmatmul.mubr.f32.vlgmr.msra.gmra.mxu1 %v911_v53  ;;  %1601 = vmatprep.subr.mxu1 %v1901_v0 }
 0x15a   : > { %1602 = vmatpush3.msra.mxu1 %v871_v62  ;;  %1605 = vmatprep.mubr.msk.f32.mxu1 %vm1902_vm1, %v1901_v0 }
 0x15b   : > { %1603 = vmatprep.subr.mxu1 %v1901_v0 }
 0x15c   : > { %1604 = vmatpush3.msra.mxu1 %v874_v59 }
 0x15d   : > { %1606 = vmatmul.mubr.f32.vlgmr.msra.gmra.mxu1 %v2123_v38 }
 0x20d   : > { %v915_v8 = vpop.f32.mrf.mxu0 }
 0x20f   : > { %v1572_v9 = vpop.f32.mrf.mxu0 }
 0x211   : > { %v1072_v10 = vpop.f32.mrf.mxu0 }
 0x213   : > { %v1586_v11 = vpop.f32.mrf.mxu0 }
 0x215   : > { %v996_v12 = vpop.f32.mrf.mxu1 }
 0x216   : > { %v997_v13 = vadd.f32 %v996_v12, %v915_v8 }
 0x217   : > { %v1579_v14 = vpop.f32.mrf.mxu1 }
 0x218   : > { %v1073_v15 = vadd.f32 %v1072_v10, %v997_v13  ;;  %v1224_v16 = vpop.f32.mrf.mxu0 }
 0x219   : > { %v1147_v17 = vpop.f32.mrf.mxu1 }
 0x21a   : > { %v1148_v18 = vadd.f32 %v1147_v17, %v1073_v15  ;;  %v1600_v19 = vpop.f32.mrf.mxu0 }
 0x21b   : > { %v1593_v20 = vpop.f32.mrf.mxu1 }
 0x21c   : > { %v1225_v21 = vadd.f32 %v1224_v16, %v1148_v18 }
 0x21d   : > { %v1297_v0 = vpop.f32.mrf.mxu1 }
 0x21e   : > { %v1298_v23 = vadd.f32 %v1297_v0, %v1225_v21 }
 0x21f   : > { %v1607_v24 = vpop.f32.mrf.mxu1 }
 0x220   : > { %v1308_v25 = vadd.f32 %v1541_v22, %v1298_v23  ;;  %v1310_v26 = vrot.slane %v1298_v23, 4  ;;  %v1317_v27 = vmul.f32 %v1298_v23, %v1298_v23 }
 0x222   : > { %v1311_v28 = vadd.f32 %v1310_v26, %v1298_v23  ;;  %v1318_v29 = vrot.slane %v1317_v27, 4  ;;  %1309 = vst [vmem:[%s321_s19] sm:$0xff] %v1308_v25 }
 0x223   : > { %1779 = shalt.err (!%p1776_p9)
}
 0x224   : > { %s1780_s10 = scalar_lea.hbm %s2155_s30, 128  ;;  %s1784_s27 = scalar_lea.hbm %s2271_s4, 256 }
 0x225   : > { %p1781_p1 = scmp.ne.s32.totalorder %s2155_s30, %s1780_s10  ;;  %p1785_p7 = scmp.lt.s32.totalorder %s2155_s30, %s2271_s4 }
 0x226   : > { %p1786_p11 = scmp.lt.s32.totalorder %s1784_s27, %s1780_s10 }
 0x227   : > { %p1782_p4 = pnand %p1781_p1, %p2295_p12 }
 0x228   : > { %p1787_p8 = por %p1786_p11, %p1785_p7 }
 0x229   : > { %p1783_p6 = pneg %p1782_p4 }
 0x22b   : > { %p1788_p3 = pnand %p1787_p8, %p1783_p6 }
 0x22d   : > { %1791 = shalt.err (!%p1788_p3)
}
 0x22e   : > { %1616 = dma.vmem_to_hbm [thread:$0]  (%p2295_p12), %s2157_s20, 128, %s2155_s30, %s1326_s7   ;;  %v1312_v30 = vrot.slane %v1311_v28, 2  ;;  %v1319_v31 = vadd.f32 %v1318_v29, %v1317_v27 }
 0x22f   : > { %s1544_s19 = sshll.u32 %s1962_s25, 4  ;;  %s327_s14 = scalar_lea.vmem [#allocation10], %s2084_s2 }
 0x230   : > { %v1313_v32 = vadd.f32 %v1312_v30, %v1311_v28  ;;  %v1320_v33 = vrot.slane %v1319_v31, 2  ;;  %s1360_s26 = sshll.u32 %s327_s14, 4  ;;  %s333_s11 = scalar_lea.vmem [#allocation12], %s2084_s2  ;;  %s2190_s26 = int_to_ptr.vmem [resolvable:$true] %s1360_s26 }
 0x231   : > { %s1373_s8 = sshll.u32 %s333_s11, 4  ;;  %s2188_s20 = scalar_lea.hbm %s2272_s5, %s1544_s19  ;;  %s2197_s8 = int_to_ptr.vmem [resolvable:$true] %s1373_s8 }
 0x232   : > { %v1321_v34 = vadd.f32 %v1320_v33, %v1319_v31  ;;  %v1314_v35 = vrot.slane %v1313_v32, 1  ;;  %s2195_s10 = scalar_lea.hbm %s2273_s6, %s1544_s19  ;;  %s2201_s13 = scalar_lea.sflag [#allocation11], %s284_s29 }
 0x233   : > { %s1792_s16 = scalar_lea.vmem %s2190_s26, 16  ;;  %s1904_s27 = smov [#allocation10]  }
 0x234   : > { %v1322_v36 = vrot.slane %v1321_v34, 1  ;;  %v1315_v37 = vadd.f32 %v1314_v35, %v1313_v32  ;;  %p1793_p10 = scmp.ne.s32.totalorder %s2190_s26, %s1792_s16  ;;  %s1796_s17 = sshll.u32 %s1904_s27, 4  ;;  %s1797_s17 = int_to_ptr.vmem [resolvable:$false] %s1796_s17 }
 0x235   : > { %s1798_s15 = scalar_lea.vmem %s1797_s17, 32  ;;  %p1799_p0 = scmp.lt.s32.totalorder %s2190_s26, %s1797_s17 }
 0x236   : > { %1316 = vst [vmem:[%s327_s14] sm:$0x1] %v1315_v37  ;;  %v1323_v38 = vadd.f32 %v1322_v36, %v1321_v34  ;;  %p1794_p2 = pnand %p1793_p10, %p2295_p12  ;;  %p1800_p5 = scmp.lt.s32.totalorder %s1798_s15, %s1792_s16 }
 0x238   : > { %p1795_p13 = pneg %p1794_p2  ;;  %p1801_p9 = por %p1800_p5, %p1799_p0 }
 0x23a   : > { %p1802_p1 = pnand %p1801_p9, %p1795_p13 }
 0x23c   : > { %1805 = shalt.err (!%p1802_p1)
}
 0x23d   : > { %s1806_s25 = scalar_lea.hbm %s2188_s20, 16  ;;  %s1810_s14 = scalar_lea.hbm %s2272_s5, 32 }
 0x23e   : > { %p1807_p4 = scmp.ne.s32.totalorder %s2188_s20, %s1806_s25  ;;  %p1811_p11 = scmp.lt.s32.totalorder %s2188_s20, %s2272_s5 }
 0x23f   : > { %p1812_p8 = scmp.lt.s32.totalorder %s1810_s14, %s1806_s25 }
 0x240   : > { %p1808_p6 = pnand %p1807_p4, %p2295_p12 }
 0x241   : > { %p1813_p3 = por %p1812_p8, %p1811_p11 }
 0x242   : > { %p1809_p7 = pneg %p1808_p6 }
 0x244   : > { %p1814_p10 = pnand %p1813_p3, %p1809_p7 }
 0x246   : > { %1817 = shalt.err (!%p1814_p10)
}
 0x247   : > { %1617 = dma.vmem_to_hbm [thread:$0]  (%p2295_p12), %s2190_s26, 16, %s2188_s20, %s2201_s13   ;;  %1324 = vst [vmem:[%s333_s11] sm:$0x1] %v1323_v38 }
 0x248   : > { %s1818_s30 = scalar_lea.vmem %s2197_s8, 16  ;;  %s1905_s7 = smov [#allocation12]  }
 0x249   : > { %p1819_p2 = scmp.ne.s32.totalorder %s2197_s8, %s1818_s30  ;;  %s1822_s16 = sshll.u32 %s1905_s7, 4  ;;  %s1823_s16 = int_to_ptr.vmem [resolvable:$false] %s1822_s16 }
 0x24a   : > { %s1824_s27 = scalar_lea.vmem %s1823_s16, 32  ;;  %p1825_p5 = scmp.lt.s32.totalorder %s2197_s8, %s1823_s16 }
 0x24b   : > { %p1820_p13 = pnand %p1819_p2, %p2295_p12  ;;  %p1826_p9 = scmp.lt.s32.totalorder %s1824_s27, %s1818_s30 }
 0x24d   : > { %p1821_p0 = pneg %p1820_p13  ;;  %p1827_p1 = por %p1826_p9, %p1825_p5 }
 0x24f   : > { %p1828_p4 = pnand %p1827_p1, %p1821_p0 }
 0x251   : > { %1831 = shalt.err (!%p1828_p4)
}
 0x252   : > { %s1832_s2 = scalar_lea.hbm %s2195_s10, 16  ;;  %s1836_s20 = scalar_lea.hbm %s2273_s6, 32 }
 0x253   : > { %p1833_p6 = scmp.ne.s32.totalorder %s2195_s10, %s1832_s2  ;;  %p1837_p8 = scmp.lt.s32.totalorder %s2195_s10, %s2273_s6 }
 0x254   : > { %p1838_p3 = scmp.lt.s32.totalorder %s1836_s20, %s1832_s2 }
 0x255   : > { %p1834_p7 = pnand %p1833_p6, %p2295_p12 }
 0x256   : > { %p1839_p10 = por %p1838_p3, %p1837_p8 }
 0x257   : > { %p1835_p11 = pneg %p1834_p7 }
 0x259   : > { %p1840_p2 = pnand %p1839_p10, %p1835_p11 }
 0x25b   : > { %1843 = shalt.err (!%p1840_p2)
}
 0x25c   : > { %1618 = dma.vmem_to_hbm [thread:$0]  (%p2295_p12), %s2197_s8, 16, %s2195_s10, %s2201_s13  }
 0x25d PF: > { %s1385_s25 = sand.u32 1, %s1882_s21   ;;  %p2296_p13 = scmp.ne.s32.totalorder %s2283_s28, 0 }
 0x25e   : > { %p2297_p0 = scmp.ge.s32.totalorder %s1894_s24, 2  ;;  %s1386_s29 = scalar_lea.sflag [#allocation5], %s1385_s25 }
 0x260   : > { %p1634_p5 = pnand %p2297_p0, %p2296_p13 }
 0x262   : > { %p1635_p9 = pneg %p1634_p5 }
 0x264   : > { %1873 = dma.done.wait (%p1635_p9), %s1386_s29, 128  }
 0x265   : > { %1875 = vsyncadd (%p1635_p9), %s1386_s29, 4294967168  ;;  %s2298_s19 = sadd.s32 4294967294, %s1894_s24  }
 0x266   : > { %s1394_s14 = sand.u32 1, %s2298_s19  }
 0x267   : > { %s1395_s18 = scalar_lea.sflag [#allocation11], %s1394_s14 }
 0x268   : > { %1877 = dma.done.wait (%p1635_p9), %s1395_s18, 32  }
 0x269   : > { %1879 = vsyncadd (%p1635_p9), %s1395_s18, 4294967264  ;;  %s2299_s8 = sld [smem:[#allocation18_spill]]  ;;  %p26_p12 = scmp.ge.s32.totalorder %s1997_s9, 4  }
 0x26a   : > { %s2300_s23 = sld [smem:[#allocation19_spill]]  ;;  %s2301_s21 = smov %s1886_s22 }
 0x26b   : > { %s2303_s24 = smov %s1997_s9  ;;  %28 = sbr.rel (!%p26_p12) target bundleno = 11 (0xb), region = 130 }
 0x26f   : > { %s2302_s22 = smov %s2299_s8 }
 0x270   :  { %1407 = vsyncpa [#allocation4], 1 }
 0x271   :  { %1409 = vsyncpa [#allocation4 + $0x1], 1 }
 0x272   :  { %1410 = vsyncpa [#allocation7], 1 }
 0x273   :  { %1412 = vsyncpa [#allocation7 + $0x1], 1 }
 0x274   :  { %1413 = vsyncpa [#allocation5], 1 }
 0x275   :  { %1415 = vsyncpa [#allocation5 + $0x1], 1 }
 0x276   :  { %1416 = vsyncpa [#allocation11], 1 }
 0x277   :  { %1418 = vsyncpa [#allocation11 + $0x1], 1 }

</bundles_post_ra>
